<compile_context>
chip_gen: v6e
topology: v6e:2x2x1
jax: 0.10.0
libtpu: 0.0.40
codegen_flags: <defaults>
</compile_context>

<pallas_src>
import jax
import jax.numpy as jnp
from jax.experimental import pallas as pl
from jax.experimental.pallas import tpu as pltpu


def _round_up(x, m):
    return ((x + m - 1) // m) * m


def linear_kernel(x_ref, w_ref, b_ref, o_ref):
    # x_ref: (tm, D), w_ref: (D, tn), b_ref: (1, tn), o_ref: (tm, tn)
    acc = jnp.dot(x_ref[...], w_ref[...], preferred_element_type=jnp.float32)
    o_ref[...] = (acc + b_ref[...]).astype(o_ref.dtype)


def linear_forward(x, weight_t, bias, *, tm=256, tn=128, compute_dtype=None):
    """Equivalent of torch.nn.Linear forward.

    x:        [B, D] float32
    weight_t: [D, C] float32  (torch weight [C, D] pre-transposed)
    bias:     [C]    float32
    compute_dtype: optionally jnp.bfloat16 to feed the MXU bf16 operands
                   (accumulation stays f32).
    """
    B, D = x.shape
    D2, C = weight_t.shape
    assert D == D2, (D, D2)

    # Lane-dense class dim (multiple of 128) and sublane-aligned batch tile.
    C_pad = _round_up(C, tn)
    tm = min(tm, _round_up(B, 8))
    M_pad = _round_up(B, tm)

    if compute_dtype is not None:
        x = x.astype(compute_dtype)
        weight_t = weight_t.astype(compute_dtype)

    x_p = x if M_pad == B else jnp.pad(x, ((0, M_pad - B), (0, 0)))
    w_p = weight_t if C_pad == C else jnp.pad(weight_t, ((0, 0), (0, C_pad - C)))
    b_p = bias if C_pad == C else jnp.pad(bias, (0, C_pad - C))
    b_p = b_p.reshape(1, C_pad).astype(jnp.float32)

    grid = (M_pad // tm, C_pad // tn)

    out_p = pl.pallas_call(
        linear_kernel,
        out_shape=jax.ShapeDtypeStruct((M_pad, C_pad), jnp.float32),
        grid_spec=pl.GridSpec(
            grid=grid,
            in_specs=[
                pl.BlockSpec((tm, D), lambda i, j: (i, 0)),   # x tile (K un-tiled)
                pl.BlockSpec((D, tn), lambda i, j: (0, j)),   # weight tile
                pl.BlockSpec((1, tn), lambda i, j: (0, j)),   # bias tile, lane-aligned
            ],
            out_specs=pl.BlockSpec((tm, tn), lambda i, j: (i, j)),
        ),
        compiler_params=pltpu.CompilerParams(
            # Both axes independent -> shardable across v7x's 2 TensorCores.
            dimension_semantics=("parallel", "parallel"),
            # Explicit budget with headroom under v7x's 64 MiB physical VMEM.
            vmem_limit_bytes=32 * 1024 * 1024,
        ),
    )(x_p, w_p, b_p)

    # Strip padding outside the kernel.
    return out_p[:B, :C]


if __name__ == "__main__":
    key = jax.random.PRNGKey(0)

    # --- Case 1: small shapes matching TorchModel(input_size, num_classes) ---
    batch, input_size, num_classes = 8, 32, 16
    kx, kw, kb, key = jax.random.split(key, 4)

    x = jax.random.normal(kx, (batch, input_size), dtype=jnp.float32)
    bound = 1.0 / (input_size ** 0.5)
    # PyTorch stores weight as [num_classes, input_size]; kernel uses its transpose.
    weight = jax.random.uniform(
        kw, (num_classes, input_size), minval=-bound, maxval=bound, dtype=jnp.float32
    )
    bias = jax.random.uniform(
        kb, (num_classes,), minval=-bound, maxval=bound, dtype=jnp.float32
    )

    out = jax.block_until_ready(linear_forward(x, weight.T, bias))
    ref = x @ weight.T + bias
    assert out.shape == (batch, num_classes)
    assert jnp.allclose(out, ref, atol=1e-5, rtol=1e-5)

    # --- Case 2: larger shapes to exercise the 2D tiled grid (multi-step) ---
    batch2, input_size2, num_classes2 = 512, 256, 384
    kx2, kw2, kb2 = jax.random.split(key, 3)
    x2 = jax.random.normal(kx2, (batch2, input_size2), dtype=jnp.float32)
    bound2 = 1.0 / (input_size2 ** 0.5)
    weight2 = jax.random.uniform(
        kw2, (num_classes2, input_size2), minval=-bound2, maxval=bound2,
        dtype=jnp.float32,
    )
    bias2 = jax.random.uniform(
        kb2, (num_classes2,), minval=-bound2, maxval=bound2, dtype=jnp.float32
    )

    out2 = jax.block_until_ready(linear_forward(x2, weight2.T, bias2))
    ref2 = x2 @ weight2.T + bias2
    assert out2.shape == (batch2, num_classes2)
    assert jnp.allclose(out2, ref2, atol=1e-4, rtol=1e-4)

    # bf16-operand path (v6e/v7x MXU peak); f32 accumulate, looser tolerance.
    out2_bf16 = jax.block_until_ready(
        linear_forward(x2, weight2.T, bias2, compute_dtype=jnp.bfloat16)
    )
    assert jnp.allclose(out2_bf16, ref2, atol=5e-2, rtol=5e-2)

    print("KERNEL_OK")
</pallas_src>

<mosaic_0001>
module attributes {stable_mosaic.version = 11 : i64} {
  func.func @linear_kernel(%arg0: i32, %arg1: i32, %arg2: memref<8x32xf32, #tpu.memory_space<vmem>>, %arg3: memref<32x128xf32, #tpu.memory_space<vmem>>, %arg4: memref<1x128xf32, #tpu.memory_space<vmem>>, %arg5: memref<8x128xf32, #tpu.memory_space<vmem>>) attributes {dimension_semantics = [#tpu.dimension_semantics<parallel>, #tpu.dimension_semantics<parallel>], iteration_bounds = array<i64: 1, 1>, scalar_prefetch = 0 : i64, scratch_operands = 0 : i64, tpu.core_type = #tpu.core_type<tc>, window_params = [{transform_indices = @transform_0, window_bounds = array<i64: 8, 32>}, {transform_indices = @transform_1, window_bounds = array<i64: 32, 128>}, {transform_indices = @transform_2, window_bounds = array<i64: 1, 128>}, {transform_indices = @transform_3, window_bounds = array<i64: 8, 128>}]} {
    %c0 = arith.constant 0 : index
    %c0_0 = arith.constant 0 : index
    %0 = vector.load %arg2[%c0, %c0_0] : memref<8x32xf32, #tpu.memory_space<vmem>>, vector<8x32xf32>
    %c0_1 = arith.constant 0 : index
    %c0_2 = arith.constant 0 : index
    %1 = vector.load %arg3[%c0_1, %c0_2] : memref<32x128xf32, #tpu.memory_space<vmem>>, vector<32x128xf32>
    %cst = arith.constant dense<0.000000e+00> : vector<8x128xf32>
    %2 = tpu.matmul %0, %1, %cst {dimension_numbers = #tpu.dot_dimension_numbers<[1], [0], [0], [1], [0, 0, 1, 1], [], []>} : vector<8x32xf32>, vector<32x128xf32>, vector<8x128xf32> -> vector<8x128xf32>
    %c0_3 = arith.constant 0 : index
    %c0_4 = arith.constant 0 : index
    %3 = vector.load %arg4[%c0_3, %c0_4] : memref<1x128xf32, #tpu.memory_space<vmem>>, vector<1x128xf32>
    %4 = vector.broadcast %3 : vector<1x128xf32> to vector<8x128xf32>
    %5 = arith.addf %2, %4 : vector<8x128xf32>
    %c0_5 = arith.constant 0 : index
    %c0_6 = arith.constant 0 : index
    %6 = vector.load %arg5[%c0_5, %c0_6] : memref<8x128xf32, #tpu.memory_space<vmem>>, vector<8x128xf32>
    tpu.vector_store %arg5[%c0_5, %c0_6], %5 {strides = array<i32>} : memref<8x128xf32, #tpu.memory_space<vmem>>, vector<8x128xf32>,
    return
  }
  func.func @transform_0(%arg0: i32, %arg1: i32) -> (i32, i32) {
    %c0_i32 = arith.constant 0 : i32
    %c0_i32_0 = arith.constant 0 : i32
    return %arg0, %c0_i32 : i32, i32
  }
  func.func @transform_1(%arg0: i32, %arg1: i32) -> (i32, i32) {
    %c0_i32 = arith.constant 0 : i32
    %c0_i32_0 = arith.constant 0 : i32
    return %c0_i32, %arg1 : i32, i32
  }
  func.func @transform_2(%arg0: i32, %arg1: i32) -> (i32, i32) {
    %c0_i32 = arith.constant 0 : i32
    %c0_i32_0 = arith.constant 0 : i32
    return %c0_i32, %arg1 : i32, i32
  }
  func.func @transform_3(%arg0: i32, %arg1: i32) -> (i32, i32) {
    %c0_i32 = arith.constant 0 : i32
    return %arg0, %arg1 : i32, i32
  }
}

</mosaic_0001>

<bundles_post_ra>
// kernel: tpu_custom_call.1
= control target key start
LH: loop header
LB: loop body
LE: loop exit
PB: predicated region body
PF: predicated region fallthrough
CT: control target
= control target key end

     0   :  { %8 = vsyncpa [#allocation3], 0  ;;  %s274_s0 = inlined_call_operand.hbm [shape: f32[8,32], index: 0, kind: input, shape index: {}]   ;;  %s275_s1 = inlined_call_operand.hbm [shape: f32[32,128], index: 1, kind: input, shape index: {}]   ;;  %s276_s2 = inlined_call_operand.vmem [shape: f32[1,128], index: 2, kind: input, shape index: {}]   ;;  %s277_s3 = inlined_call_operand.hbm [shape: f32[8,128], index: 3, kind: output, shape index: {}]  }
   0x1   :  { %9 = vsyncpa [#allocation6], 0 }
   0x2   :  { %10 = vsyncpa [#allocation4], 0  ;;  %s235_s12 = smov [#allocation2]   ;;  %s236_s14 = smov [#allocation5]  }
   0x3   :  { %s17_s13 = sshll.u32 %s235_s12, 4  ;;  %s26_s15 = sshll.u32 %s236_s14, 4  ;;  %s18_s13 = int_to_ptr.vmem [resolvable:$true] %s17_s13  ;;  %s27_s15 = int_to_ptr.vmem [resolvable:$true] %s26_s15 }
   0x4   :  { %s177_s16 = scalar_lea.vmem %s18_s13, 128  ;;  %p182_p1 = scmp.lt.s32.totalorder %s18_s13, %s18_s13 }
   0x5   :  { %p178_p0 = scmp.ne.s32.totalorder %s18_s13, %s177_s16  ;;  %p183_p2 = scmp.lt.s32.totalorder %s177_s16, %s177_s16 }
   0x7   :  { %p184_p3 = por %p183_p2, %p182_p1 }
   0x9   :  { %p185_p4 = pnand %p184_p3, %p178_p0 }
   0xb   :  { %188 = shalt.err (!%p185_p4)
}
   0xc   :  { %20 = dma.hbm_to_vmem [thread:$0]  %s274_s0, 128, %s18_s13, [#allocation3]  }
   0xd   :  { %s197_s19 = scalar_lea.vmem %s27_s15, 512  ;;  %p202_p6 = scmp.lt.s32.totalorder %s27_s15, %s27_s15 }
   0xe   :  { %p198_p5 = scmp.ne.s32.totalorder %s27_s15, %s197_s19  ;;  %p203_p7 = scmp.lt.s32.totalorder %s197_s19, %s197_s19 }
  0x10   :  { %p204_p8 = por %p203_p7, %p202_p6 }
  0x12   :  { %p205_p9 = pnand %p204_p8, %p198_p5 }
  0x14   :  { %208 = shalt.err (!%p205_p9)
}
  0x15   :  { %s237_s20 = smov 128   ;;  %s238_s21 = smov 8  }
  0x16   :  { %32 = dma.hbm_to_vmem [thread:$0]  %s275_s1, 512, %s27_s15, [#allocation6], %s237_s20, %s237_s20, %s238_s21  }
  0x17   :  { %229 = dma.done.wait [#allocation3], 128  }
  0x18   :  { %230 = vsyncadd [#allocation3], 4294967168 }
  0x19   :  { %231 = dma.done.wait [#allocation6], 512  }
  0x1a   :  { %232 = vsyncadd [#allocation6], 4294966784  ;;  %v239_v0 = vmov 0.0   ;;  %vm240_vm0 = vmmov 0   ;;  %v45_v1 = vld [vmem:[#allocation5 + $0x18] sm:$0xff]  ;;  %v44_v2 = vld [vmem:[#allocation5 + $0x10] sm:$0xff] }
  0x1b   :  { %151 = vmatprep.subr.mxu0 %v239_v0  ;;  %159 = vmatprep.mubr.msk.f32.mxu0 %vm240_vm0, %v239_v0  ;;  %v43_v3 = vld [vmem:[#allocation5 + $0x8] sm:$0xff]  ;;  %v42_v4 = vld [vmem:[#allocation5] sm:$0xff]  ;;  %v41_v5 = vld [vmem:[#allocation2] sm:$0xff]  ;;  %vm53_vm1 = vcmask 261120   ;;  %s241_s24 = smov [#allocation7]  }
  0x1c   :  { %152 = vmatpush3.msra.mxu0 %v45_v1  ;;  %v144_v6 = vld [vmem:[%s276_s2] ss:$0 sm:$0xff]  ;;  %s134_s25 = sshll.u32 %s241_s24, 4  ;;  %s135_s25 = int_to_ptr.vmem [resolvable:$true] %s134_s25 }
  0x1d   :  { %153 = vmatprep.subr.mxu0 %v239_v0  ;;  %s209_s26 = scalar_lea.vmem %s135_s25, 128  ;;  %p214_p11 = scmp.lt.s32.totalorder %s135_s25, %s135_s25 }
  0x1e   :  { %154 = vmatpush3.msra.mxu0 %v44_v2  ;;  %p210_p10 = scmp.ne.s32.totalorder %s135_s25, %s209_s26  ;;  %p215_p12 = scmp.lt.s32.totalorder %s209_s26, %s209_s26 }
  0x1f   :  { %155 = vmatprep.subr.mxu0 %v239_v0 }
  0x20   :  { %156 = vmatpush3.msra.mxu0 %v43_v3  ;;  %p216_p13 = por %p215_p12, %p214_p11 }
  0x21   :  { %157 = vmatprep.subr.mxu0 %v239_v0 }
  0x22   :  { %158 = vmatpush3.msra.mxu0 %v42_v4  ;;  %p217_p0 = pnand %p216_p13, %p210_p10 }
  0x23   :  { %160 = vmatmul.mubr.msk.f32.vlgmr.msra.gmra.mxu0 %vm53_vm1, %v41_v5 }
  0xe3   :  { %v123_v7 = vpop.f32.mrf.mxu0 }
  0xe4   :  { %v124_v8 = vadd.f32 %v144_v6, %v123_v7 }
  0xe5   :  { %v161_v9 = vpop.f32.mrf.mxu0 }
  0xe6   :  { %127 = vst [vmem:[#allocation7] sm:$0xff] %v124_v8 }
  0xe7   :  { %220 = shalt.err (!%p217_p0)
}
  0xe8   :  { %137 = dma.vmem_to_hbm [thread:$0]  %s135_s25, 128, %s277_s3, [#allocation4]  }
  0xe9   :  { %233 = dma.done.wait [#allocation4], 128  }
  0xea   :  { %234 = vsyncadd [#allocation4], 4294967168 }
  0xeb   :  { %141 = vsyncpa [#allocation3], 1 }
  0xec   :  { %142 = vsyncpa [#allocation6], 1 }
  0xed   :  { %143 = vsyncpa [#allocation4], 1 }

</bundles_post_ra>
